<compile_context>
chip_gen: v5e
topology: v5e:2x2
jax: 0.10.0
libtpu: 0.0.40
codegen_flags: <defaults>
</compile_context>

<pallas_src>
import jax
import jax.numpy as jnp
from jax.experimental import pallas as pl
from jax.experimental.pallas import tpu as pltpu


# ---------------------------------------------------------------------------
# Kernels
# ---------------------------------------------------------------------------

def _abs2_stacked_kernel(x_ref, o_ref):
    # x_ref block: (2, tr, C) float32 -- [0] = real plane, [1] = imag plane.
    re = x_ref[0]
    im = x_ref[1]
    o_ref[...] = re * re + im * im


def _square_kernel(x_ref, o_ref):
    # Native-dtype real input (f32 / bf16 / f16); upcast in-register (VPU has
    # huge slack, HBM is the binding resource).
    v = x_ref[...].astype(jnp.float32)
    o_ref[...] = v * v


# ---------------------------------------------------------------------------
# Tiling helpers (host-side, static shapes)
# ---------------------------------------------------------------------------

def _round_up(x, m):
    return -(-x // m) * m


def _target_block_bytes():
    """~4 MiB f32 blocks on v6e/v7x, ~2 MiB on v5e/older (16 MiB scoped VMEM)."""
    try:
        kind = jax.devices()[0].device_kind.lower()
    except Exception:
        kind = ""
    if (not kind) or ("v5" in kind) or ("v4" in kind) or ("v3" in kind) or ("v2" in kind):
        return 2 * 1024 * 1024
    return 4 * 1024 * 1024


def _pick_tile_rows(rows, cols, bytes_per_elem, row_align, target_bytes):
    """Row-tile: aligned, ~target_bytes per plane, and >=2 grid blocks when possible."""
    bytes_per_row = cols * bytes_per_elem
    target = max(row_align, (target_bytes // bytes_per_row) // row_align * row_align)
    if rows <= row_align:
        return rows                       # single full-rows block (always legal)
    if rows <= target:
        # Split into >= 2 grid blocks so v7x megacore gets work on both cores.
        half = _round_up(_round_up(rows, 2) // 2, row_align)
        return max(row_align, min(target, half))
    return target                         # multiple of row_align; ragged tail masked


def _factor_cols(n):
    """Largest multiple-of-128 divisor of n (preferring >= 8 rows), else None."""
    best = None
    for c in range(4096, 127, -128):
        if n % c == 0:
            if best is None:
                best = c
            if n // c >= 8:
                return c
    return best


def _vmem_limit(in_block_bytes, out_block_bytes):
    # Double-buffered inputs + output, plus margin; capped well under v7x's
    # 64 MiB physical VMEM per TensorCore.
    live = 2 * (in_block_bytes + out_block_bytes)
    return int(min(live + (8 << 20), 48 << 20))


# ---------------------------------------------------------------------------
# pallas_call wrappers
# ---------------------------------------------------------------------------

def _abs2_complex_pallas(stacked):
    """stacked: (2, R, C) float32 real/imag planes -> (R, C) float32 |x|^2."""
    _, R, C = stacked.shape
    tr = _pick_tile_rows(R, C, 4, 8, _target_block_bytes())
    in_block = 2 * tr * C * 4
    out_block = tr * C * 4
    return pl.pallas_call(
        _abs2_stacked_kernel,
        out_shape=jax.ShapeDtypeStruct((R, C), jnp.float32),
        grid=(pl.cdiv(R, tr),),
        in_specs=[pl.BlockSpec((2, tr, C), lambda i: (0, i, 0))],
        out_specs=pl.BlockSpec((tr, C), lambda i: (i, 0)),
        compiler_params=pltpu.CompilerParams(
            dimension_semantics=("parallel",),
            vmem_limit_bytes=_vmem_limit(in_block, out_block),
        ),
    )(stacked)


def _square_real_pallas(x2d):
    """x2d: (R, C) native floating dtype -> (R, C) float32 x*x."""
    R, C = x2d.shape
    itemsize = jnp.dtype(x2d.dtype).itemsize
    row_align = {4: 8, 2: 16, 1: 32}.get(itemsize, 8)
    tr = _pick_tile_rows(R, C, max(4, itemsize), row_align, _target_block_bytes())
    in_block = tr * C * itemsize
    out_block = tr * C * 4
    alias = {0: 0} if x2d.dtype == jnp.float32 else {}
    return pl.pallas_call(
        _square_kernel,
        out_shape=jax.ShapeDtypeStruct((R, C), jnp.float32),
        grid=(pl.cdiv(R, tr),),
        in_specs=[pl.BlockSpec((tr, C), lambda i: (i, 0))],
        out_specs=pl.BlockSpec((tr, C), lambda i: (i, 0)),
        input_output_aliases=alias,
        compiler_params=pltpu.CompilerParams(
            dimension_semantics=("parallel",),
            vmem_limit_bytes=_vmem_limit(in_block, out_block),
        ),
    )(x2d)


# ---------------------------------------------------------------------------
# Forward wrapper
# ---------------------------------------------------------------------------

def measure_forward(x: jax.Array) -> jax.Array:
    """JAX/Pallas equivalent of torch `measure.forward`: |x|^2 as complex64."""
    orig_shape = x.shape
    n = 1
    for d in orig_shape:
        n *= d
    if n == 0:
        return jnp.zeros(orig_shape, jnp.complex64)

    if jnp.iscomplexobj(x):
        re = jnp.real(x).astype(jnp.float32).reshape(-1)
        im = jnp.imag(x).astype(jnp.float32).reshape(-1)
    else:
        # Stream the native floating dtype; kernel upcasts in-register.
        # TODO(synk): torch squares real bf16/f16 inputs in their own
        # precision before the cfloat cast; here they are squared in f32
        # (slightly more precise). int/f64 inputs go through an f32 cast.
        if x.dtype not in (jnp.float32, jnp.bfloat16, jnp.float16):
            x = x.astype(jnp.float32)
        re = x.reshape(-1)
        im = None

    # Factor n into (rows, cols) with cols a multiple of 128 (free reshape).
    cols = _factor_cols(n)
    pad = 0
    if cols is None:
        # Ragged fallback: pad flat array(s) to an (8, 512)-aligned slab.
        cols = 512
        rows = _round_up(pl.cdiv(n, cols), 8)
        pad = rows * cols - n
        re = jnp.pad(re, (0, pad))
        if im is not None:
            im = jnp.pad(im, (0, pad))
    else:
        rows = n // cols

    if im is not None:
        # One stacked operand => one fused re/im extraction pass and a single
        # lane-dense Pallas input stream.
        stacked = jnp.stack([re.reshape(rows, cols), im.reshape(rows, cols)], axis=0)
        out2d = _abs2_complex_pallas(stacked)
    else:
        out2d = _square_real_pallas(re.reshape(rows, cols))

    out_flat = out2d.reshape(-1)
    if pad:
        out_flat = out_flat[:n]
    # torch.cfloat == complex64 (imaginary part zero).
    return out_flat.reshape(orig_shape).astype(jnp.complex64)


# ---------------------------------------------------------------------------
# Self-test
# ---------------------------------------------------------------------------

if __name__ == "__main__":
    key = jax.random.PRNGKey(0)
    k_re, k_im, k_bf = jax.random.split(key, 3)
    B, C, H, W = 2, 4, 16, 16  # NCHW
    x_re = jax.random.normal(k_re, (B, C, H, W), dtype=jnp.float32)
    x_im = jax.random.normal(k_im, (B, C, H, W), dtype=jnp.float32)
    x = x_re + 1j * x_im  # complex64 input

    measure = jax.jit(measure_forward)

    # Complex path (stacked single-input |.|^2 kernel).
    y = jax.block_until_ready(measure(x))
    ref = (jnp.abs(x) ** 2).astype(jnp.complex64)
    assert y.shape == (B, C, H, W) and y.dtype == jnp.complex64
    assert jnp.allclose(y, ref, atol=1e-5, rtol=1e-5)

    # Real float32 path (aliased square kernel).
    y_r = jax.block_until_ready(measure(x_re))
    ref_r = (jnp.abs(x_re) ** 2).astype(jnp.complex64)
    assert y_r.dtype == jnp.complex64
    assert jnp.allclose(y_r, ref_r, atol=1e-5, rtol=1e-5)

    # Real bfloat16 path (native-dtype streaming, in-register upcast).
    x_bf = jax.random.normal(k_bf, (B, C, H, W), dtype=jnp.float32).astype(jnp.bfloat16)
    y_bf = jax.block_until_ready(measure(x_bf))
    ref_bf = (jnp.abs(x_bf.astype(jnp.float32)) ** 2).astype(jnp.complex64)
    assert y_bf.dtype == jnp.complex64
    assert jnp.allclose(y_bf, ref_bf, atol=1e-5, rtol=1e-5)

    # Ragged shape (exercises the padded-slab fallback).
    x_rag = jax.random.normal(k_re, (3, 5, 7), dtype=jnp.float32)
    y_rag = jax.block_until_ready(measure(x_rag))
    ref_rag = (jnp.abs(x_rag) ** 2).astype(jnp.complex64)
    assert y_rag.shape == (3, 5, 7) and y_rag.dtype == jnp.complex64
    assert jnp.allclose(y_rag, ref_rag, atol=1e-5, rtol=1e-5)

    print("KERNEL_OK")
</pallas_src>

<mosaic_0001>
module attributes {stable_mosaic.version = 11 : i64} {
  func.func @_abs2_stacked_kernel(%arg0: i32, %arg1: memref<2x8x256xf32, #tpu.memory_space<vmem>>, %arg2: memref<8x256xf32, #tpu.memory_space<vmem>>) attributes {dimension_semantics = [#tpu.dimension_semantics<parallel>], iteration_bounds = array<i64: 1>, scalar_prefetch = 0 : i64, scratch_operands = 0 : i64, tpu.core_type = #tpu.core_type<tc>, window_params = [{transform_indices = @transform_0, window_bounds = array<i64: 2, 8, 256>}, {transform_indices = @transform_1, window_bounds = array<i64: 8, 256>}]} {
    %c0 = arith.constant 0 : index
    %c0_0 = arith.constant 0 : index
    %c0_1 = arith.constant 0 : index
    %0 = vector.load %arg1[%c0, %c0_0, %c0_1] : memref<2x8x256xf32, #tpu.memory_space<vmem>>, vector<1x8x256xf32>
    %1 = vector.shape_cast %0 : vector<1x8x256xf32> to vector<8x256xf32>
    %c1 = arith.constant 1 : index
    %c0_2 = arith.constant 0 : index
    %c0_3 = arith.constant 0 : index
    %2 = vector.load %arg1[%c1, %c0_2, %c0_3] : memref<2x8x256xf32, #tpu.memory_space<vmem>>, vector<1x8x256xf32>
    %3 = vector.shape_cast %2 : vector<1x8x256xf32> to vector<8x256xf32>
    %4 = arith.mulf %1, %1 : vector<8x256xf32>
    %5 = arith.mulf %3, %3 : vector<8x256xf32>
    %6 = arith.addf %4, %5 : vector<8x256xf32>
    %c0_4 = arith.constant 0 : index
    %c0_5 = arith.constant 0 : index
    %7 = vector.load %arg2[%c0_4, %c0_5] : memref<8x256xf32, #tpu.memory_space<vmem>>, vector<8x256xf32>
    tpu.vector_store %arg2[%c0_4, %c0_5], %6 {strides = array<i32>} : memref<8x256xf32, #tpu.memory_space<vmem>>, vector<8x256xf32>,
    return
  }
  func.func @transform_0(%arg0: i32) -> (i32, i32, i32) {
    %c0_i32 = arith.constant 0 : i32
    %c0_i32_0 = arith.constant 0 : i32
    %c0_i32_1 = arith.constant 0 : i32
    return %c0_i32, %arg0, %c0_i32_0 : i32, i32, i32
  }
  func.func @transform_1(%arg0: i32) -> (i32, i32) {
    %c0_i32 = arith.constant 0 : i32
    %c0_i32_0 = arith.constant 0 : i32
    return %arg0, %c0_i32 : i32, i32
  }
}

</mosaic_0001>

<bundles_post_ra>
// kernel: custom-call.1
= control target key start
LH: loop header
LB: loop body
LE: loop exit
PB: predicated region body
PF: predicated region fallthrough
CT: control target
= control target key end

     0   :  { %s56_s0 = inlined_call_operand.hbm [shape: c64[2,4,16,16], index: 0, kind: input, shape index: {}]   ;;  %s57_s1 = inlined_call_operand.vmem [shape: f32[2,4,16,16], index: 1, kind: output, shape index: {}]  }
   0x1   :  { %s2_s8 = scalar_lea.hbm %s56_s0, 128 }
   0x2   :  { %3 = vsyncpa [#allocation0], 0  ;;  %s5_s9 = sshll.u32 %s2_s8, 4  ;;  %s7_s12 = sshll.u32 %s57_s1, 4  ;;  %s6_s9 = int_to_ptr.hbm [resolvable:$true] %s5_s9  ;;  %s8_s12 = int_to_ptr.vmem [resolvable:$true] %s7_s12 }
   0x3   :  { %10 = dma.hbm_to_vmem [thread:$0]  %s6_s9, 2048, %s8_s12, [#allocation0] }
   0x4   :  { %38 = dma.done.wait [#allocation0], 2048  }
   0x5   :  { %39 = vsyncadd [#allocation0], 4294965248 }
   0x6   :  { %13 = vsyncpa [#allocation0], 1 }

// kernel: custom-call
= control target key start
LH: loop header
LB: loop body
LE: loop exit
PB: predicated region body
PF: predicated region fallthrough
CT: control target
= control target key end

     0   :  { %2 = vsyncpa [#allocation0], 0  ;;  %s55_s0 = inlined_call_operand.hbm [shape: c64[2,4,16,16], index: 0, kind: input, shape index: {}]   ;;  %s56_s1 = inlined_call_operand.vmem [shape: f32[2,4,16,16], index: 1, kind: output, shape index: {}]  }
   0x1   :  { %s4_s8 = sshll.u32 %s55_s0, 4  ;;  %s6_s11 = sshll.u32 %s56_s1, 4  ;;  %s5_s8 = int_to_ptr.hbm [resolvable:$true] %s4_s8  ;;  %s7_s11 = int_to_ptr.vmem [resolvable:$true] %s6_s11 }
   0x2   :  { %9 = dma.hbm_to_vmem [thread:$0]  %s5_s8, 2048, %s7_s11, [#allocation0] }
   0x3   :  { %37 = dma.done.wait [#allocation0], 2048  }
   0x4   :  { %38 = vsyncadd [#allocation0], 4294965248 }
   0x5   :  { %12 = vsyncpa [#allocation0], 1 }

// kernel: custom-call.2
= control target key start
LH: loop header
LB: loop body
LE: loop exit
PB: predicated region body
PF: predicated region fallthrough
CT: control target
= control target key end

     0   :  { %s105_s0 = inlined_call_operand.vmem [shape: f32[2,4,16,16], index: 0, kind: input, shape index: {}]   ;;  %s106_s1 = inlined_call_operand.vmem [shape: f32[2,4,16,16], index: 1, kind: input, shape index: {}]   ;;  %s107_s2 = inlined_call_operand.hbm [shape: c64[2,4,16,16], index: 2, kind: output, shape index: {}]  }
   0x1   :  { %s3_s11 = scalar_lea.hbm %s107_s2, 128 }
   0x2   :  { %4 = vsyncpa [#allocation0], 0  ;;  %s6_s14 = sshll.u32 %s105_s0, 4  ;;  %s8_s17 = sshll.u32 %s107_s2, 4  ;;  %s7_s14 = int_to_ptr.vmem [resolvable:$true] %s6_s14  ;;  %s9_s17 = int_to_ptr.hbm [resolvable:$true] %s8_s17 }
   0x3   :  { %11 = dma.vmem_to_hbm [thread:$0]  %s7_s14, 2048, %s9_s17, [#allocation0] }
   0x4   :  { %74 = dma.done.wait [#allocation0], 2048  }
   0x5   :  { %75 = vsyncadd [#allocation0], 4294965248 }
   0x6   :  { %14 = vsyncpa [#allocation0], 1 }
   0x7   :  { %15 = vsyncpa [#allocation1], 0  ;;  %s17_s20 = sshll.u32 %s106_s1, 4  ;;  %s19_s21 = sshll.u32 %s3_s11, 4  ;;  %s18_s20 = int_to_ptr.vmem [resolvable:$true] %s17_s20  ;;  %s20_s21 = int_to_ptr.hbm [resolvable:$true] %s19_s21 }
   0x8   :  { %22 = dma.vmem_to_hbm [thread:$0]  %s18_s20, 2048, %s20_s21, [#allocation1] }
   0x9   :  { %76 = dma.done.wait [#allocation1], 2048  }
   0xa   :  { %77 = vsyncadd [#allocation1], 4294965248 }
   0xb   :  { %25 = vsyncpa [#allocation1], 1 }

// kernel: measure_forward.1
= control target key start
LH: loop header
LB: loop body
LE: loop exit
PB: predicated region body
PF: predicated region fallthrough
CT: control target
= control target key end

     0   :  { %s55_s0 = inlined_call_operand.vmem [shape: f32[2,8,256], index: 0, kind: input, shape index: {}]   ;;  %s56_s1 = inlined_call_operand.vmem [shape: f32[8,256], index: 1, kind: output, shape index: {}]  }
   0x1   :  { %v8_v0 = vld [vmem:[%s55_s0] sm:$0xff]  ;;  %v25_v1 = vld [vmem:[%s55_s0 + $0x10] sm:$0xff]  ;;  %v9_v2 = vld [vmem:[%s55_s0 + $0x8] sm:$0xff] }
   0x2   :  { %v13_v3 = vmul.f32 %v8_v0, %v8_v0  ;;  %v15_v4 = vmul.f32 %v25_v1, %v25_v1  ;;  %v26_v5 = vld [vmem:[%s55_s0 + $0x18] sm:$0xff]  ;;  %v14_v6 = vmul.f32 %v9_v2, %v9_v2 }
   0x3   :  { %v16_v7 = vmul.f32 %v26_v5, %v26_v5 }
   0x4   :  { %v17_v8 = vadd.f32 %v15_v4, %v13_v3 }
   0x5   :  { %v18_v9 = vadd.f32 %v16_v7, %v14_v6 }
   0x6   :  { %19 = vst [vmem:[%s56_s1] sm:$0xff] %v17_v8 }
   0x7   :  { %20 = vst [vmem:[%s56_s1 + $0x8] sm:$0xff] %v18_v9 }

</bundles_post_ra>
